<compile_context>
chip_gen: v5e
topology: v5e:2x2
jax: 0.10.0
libtpu: 0.0.40
codegen_flags: <defaults>
</compile_context>

<pallas_src>
import jax
import jax.numpy as jnp
from jax.experimental import pallas as pl
from jax.experimental.pallas import tpu as pltpu

_VMEM_LIMIT = 32 * 1024 * 1024  # explicit scoped-VMEM budget (safe on v5e/v6e/v7x)


# ---------------------------------------------------------------------------
# Tiling helpers (trace-time, pure Python ints)
# ---------------------------------------------------------------------------
def _pick_row_tile(rows: int, lane: int) -> int:
    """Largest row tile dividing `rows`, multiple of 8, ~<=1 MiB per f32 block.
    Falls back to the full row extent (always a legal block shape)."""
    max_tile = max(8, (1024 * 1024) // (lane * 4))
    for t in range(min(rows, max_tile), 7, -1):
        if rows % t == 0 and t % 8 == 0:
            return t
    return rows


def _plan_2d(n: int, fallback_cols: int):
    """Pick a lane-dense (rows, lane) factorization of n plus a row tile."""
    for lane in (1024, 512, 256, 128):
        if n % lane == 0:
            rows = n // lane
            return rows, lane, _pick_row_tile(rows, lane)
    # Fallback for odd sizes: single whole-array block (small inputs only).
    rows = n // fallback_cols
    return rows, fallback_cols, rows


# ---------------------------------------------------------------------------
# Kernels
# ---------------------------------------------------------------------------
def _minmax_kernel(x_ref, mn_ref, mx_ref):
    # Resident (1,1) accumulators across the "arbitrary" grid axis.
    @pl.when(pl.program_id(0) == 0)
    def _init():
        mn_ref[...] = jnp.full_like(mn_ref, jnp.inf)
        mx_ref[...] = jnp.full_like(mx_ref, -jnp.inf)

    x = x_ref[...].astype(jnp.float32)
    mn_ref[...] = jnp.minimum(mn_ref[...], jnp.min(x))
    mx_ref[...] = jnp.maximum(mx_ref[...], jnp.max(x))


def _normalize_kernel(params_ref, x_ref, o_ref):
    mn = params_ref[0]       # global min           (SMEM scalar)
    scale = params_ref[1]    # 1 / (max - min)       (hoisted reciprocal)
    x = x_ref[...].astype(jnp.float32)
    o_ref[...] = ((x - mn) * scale).astype(o_ref.dtype)


def _depth_combine_kernel(even_ref, odd_ref, o_ref):
    o_ref[...] = 256.0 * odd_ref[...] + even_ref[...]


# ---------------------------------------------------------------------------
# Wrappers
# ---------------------------------------------------------------------------
def rgb_normalize(rgb):
    shape = rgb.shape
    rows, lane, tr = _plan_2d(rgb.size, shape[-1])
    x2d = rgb.reshape(rows, lane)          # free row-major reshape (lane-dense)
    grid = (rows // tr,)

    # Pass 1: tiled global min/max reduction.
    mn, mx = pl.pallas_call(
        _minmax_kernel,
        out_shape=(jax.ShapeDtypeStruct((1, 1), jnp.float32),
                   jax.ShapeDtypeStruct((1, 1), jnp.float32)),
        grid=grid,
        in_specs=[pl.BlockSpec((tr, lane), lambda i: (i, 0))],
        out_specs=(pl.BlockSpec((1, 1), lambda i: (0, 0)),
                   pl.BlockSpec((1, 1), lambda i: (0, 0))),
        compiler_params=pltpu.CompilerParams(
            dimension_semantics=("arbitrary",),      # accumulator axis
            vmem_limit_bytes=_VMEM_LIMIT),
    )(x2d)

    mn_s = mn[0, 0]
    scale = 1.0 / (mx[0, 0] - mn_s)                  # single scalar reciprocal
    params = jnp.stack([mn_s, scale]).astype(jnp.float32)   # f32[2] -> SMEM

    # Pass 2: tiled elementwise normalize.
    out = pl.pallas_call(
        _normalize_kernel,
        out_shape=jax.ShapeDtypeStruct((rows, lane), rgb.dtype),
        grid=grid,
        in_specs=[pl.BlockSpec(memory_space=pltpu.MemorySpace.SMEM),
                  pl.BlockSpec((tr, lane), lambda i: (i, 0))],
        out_specs=pl.BlockSpec((tr, lane), lambda i: (i, 0)),
        compiler_params=pltpu.CompilerParams(
            dimension_semantics=("parallel",),       # both TCs on v7x
            vmem_limit_bytes=_VMEM_LIMIT),
    )(params, x2d)
    return out.reshape(shape)


def depth_combine(depth):
    if depth is None:
        return None
    B, C, H, W = depth.shape
    half = W // 2

    # Pairs (even, odd) are adjacent in the row-major flat order (W is even),
    # so reshape(-1, 2) + column slices is the cheapest de-interleave at XLA
    # level; the lane-dense (rows, lane) views feeding the kernel are free.
    flat = depth.reshape(-1, 2)
    even = flat[:, 0]
    odd = flat[:, 1]

    rows, lane, tr = _plan_2d(even.size, half)
    even2 = even.reshape(rows, lane)
    odd2 = odd.reshape(rows, lane)
    grid = (rows // tr,)

    out = pl.pallas_call(
        _depth_combine_kernel,
        out_shape=jax.ShapeDtypeStruct((rows, lane), depth.dtype),
        grid=grid,
        in_specs=[pl.BlockSpec((tr, lane), lambda i: (i, 0)),
                  pl.BlockSpec((tr, lane), lambda i: (i, 0))],
        out_specs=pl.BlockSpec((tr, lane), lambda i: (i, 0)),
        compiler_params=pltpu.CompilerParams(
            dimension_semantics=("parallel",),
            vmem_limit_bytes=_VMEM_LIMIT),
    )(even2, odd2)
    return out.reshape(B, C, H, half)


def pre_forward(rgb, depth):
    """Equivalent of pre.forward(rgb, depth); keep both ops in one jit so XLA
    schedules the (independent) rgb and depth kernels back-to-back."""
    return rgb_normalize(rgb), depth_combine(depth)


# ---------------------------------------------------------------------------
# Self-test
# ---------------------------------------------------------------------------
if __name__ == "__main__":
    key = jax.random.PRNGKey(0)
    k_rgb, k_depth = jax.random.split(key)

    # NCHW inputs; W even so the byte-pair combine is well defined.
    rgb = jax.random.uniform(k_rgb, (2, 3, 16, 16), dtype=jnp.float32) * 255.0
    depth = jax.random.uniform(k_depth, (2, 1, 16, 16), dtype=jnp.float32) * 255.0

    fwd = jax.jit(pre_forward)
    rgb_out, depth_out = fwd(rgb, depth)
    jax.block_until_ready((rgb_out, depth_out))

    # Pure-JAX reference
    rgb_ref = (rgb - rgb.min()) / (rgb.max() - rgb.min())
    depth_ref = 256.0 * depth[:, :, :, 1::2] + depth[:, :, :, 0::2]

    assert rgb_out.shape == rgb.shape
    assert depth_out.shape == (2, 1, 16, 8)
    assert jnp.allclose(rgb_out, rgb_ref, atol=1e-6, rtol=1e-5)
    assert jnp.allclose(depth_out, depth_ref, atol=1e-6, rtol=1e-6)

    print("KERNEL_OK")
</pallas_src>

<mosaic_0001>
module attributes {stable_mosaic.version = 11 : i64} {
  func.func @_minmax_kernel(%arg0: i32, %arg1: memref<3x512xf32, #tpu.memory_space<vmem>>, %arg2: memref<1x1xf32, #tpu.memory_space<vmem>>, %arg3: memref<1x1xf32, #tpu.memory_space<vmem>>) attributes {dimension_semantics = [#tpu.dimension_semantics<arbitrary>], iteration_bounds = array<i64: 1>, scalar_prefetch = 0 : i64, scratch_operands = 0 : i64, tpu.core_type = #tpu.core_type<tc>, window_params = [{transform_indices = @transform_0, window_bounds = array<i64: 3, 512>}, {pipeline_mode = #tpu.pipeline_mode<synchronous>, transform_indices = @transform_1, window_bounds = array<i64: 1, 1>}, {pipeline_mode = #tpu.pipeline_mode<synchronous>, transform_indices = @transform_2, window_bounds = array<i64: 1, 1>}]} {
    %c0_i32 = arith.constant 0 : i32
    %0 = arith.cmpi eq, %arg0, %c0_i32 : i32
    %1 = arith.extui %0 : i1 to i32
    %c0_i32_0 = arith.constant 0 : i32
    %2 = arith.cmpi ne, %1, %c0_i32_0 : i32
    scf.if %2 {
      %cst_11 = arith.constant 0x7F800000 : f32
      %20 = vector.broadcast %cst_11 : f32 to vector<1x1xf32>
      %c0_12 = arith.constant 0 : index
      %c0_13 = arith.constant 0 : index
      %21 = vector.load %arg2[%c0_12, %c0_13] : memref<1x1xf32, #tpu.memory_space<vmem>>, vector<1x1xf32>
      tpu.vector_store %arg2[%c0_12, %c0_13], %20 {strides = array<i32>} : memref<1x1xf32, #tpu.memory_space<vmem>>, vector<1x1xf32>,
      %cst_14 = arith.constant 0xFF800000 : f32
      %22 = vector.broadcast %cst_14 : f32 to vector<1x1xf32>
      %c0_15 = arith.constant 0 : index
      %c0_16 = arith.constant 0 : index
      %23 = vector.load %arg3[%c0_15, %c0_16] : memref<1x1xf32, #tpu.memory_space<vmem>>, vector<1x1xf32>
      tpu.vector_store %arg3[%c0_15, %c0_16], %22 {strides = array<i32>} : memref<1x1xf32, #tpu.memory_space<vmem>>, vector<1x1xf32>,
    } else {
    }
    %c0 = arith.constant 0 : index
    %c0_1 = arith.constant 0 : index
    %3 = vector.load %arg1[%c0, %c0_1] : memref<3x512xf32, #tpu.memory_space<vmem>>, vector<3x512xf32>
    %c0_2 = arith.constant 0 : index
    %c0_3 = arith.constant 0 : index
    %4 = vector.load %arg2[%c0_2, %c0_3] : memref<1x1xf32, #tpu.memory_space<vmem>>, vector<1x1xf32>
    %5 = vector.shape_cast %3 : vector<3x512xf32> to vector<1x3x512xf32>
    %cst = arith.constant dense<0x7F800000> : vector<1xf32>
    %6 = vector.multi_reduction <minimumf>, %5, %cst [1, 2] : vector<1x3x512xf32> to vector<1xf32>
    %7 = vector.shape_cast %6 : vector<1xf32> to vector<1x1x1xf32>
    %8 = vector.extract %7[0, 0, 0] : f32 from vector<1x1x1xf32>
    %9 = vector.broadcast %8 : f32 to vector<1x1xf32>
    %10 = arith.minimumf %4, %9 : vector<1x1xf32>
    %c0_4 = arith.constant 0 : index
    %c0_5 = arith.constant 0 : index
    %11 = vector.load %arg2[%c0_4, %c0_5] : memref<1x1xf32, #tpu.memory_space<vmem>>, vector<1x1xf32>
    tpu.vector_store %arg2[%c0_4, %c0_5], %10 {strides = array<i32>} : memref<1x1xf32, #tpu.memory_space<vmem>>, vector<1x1xf32>,
    %c0_6 = arith.constant 0 : index
    %c0_7 = arith.constant 0 : index
    %12 = vector.load %arg3[%c0_6, %c0_7] : memref<1x1xf32, #tpu.memory_space<vmem>>, vector<1x1xf32>
    %13 = vector.shape_cast %3 : vector<3x512xf32> to vector<1x3x512xf32>
    %cst_8 = arith.constant dense<0xFF800000> : vector<1xf32>
    %14 = vector.multi_reduction <maximumf>, %13, %cst_8 [1, 2] : vector<1x3x512xf32> to vector<1xf32>
    %15 = vector.shape_cast %14 : vector<1xf32> to vector<1x1x1xf32>
    %16 = vector.extract %15[0, 0, 0] : f32 from vector<1x1x1xf32>
    %17 = vector.broadcast %16 : f32 to vector<1x1xf32>
    %18 = arith.maximumf %12, %17 : vector<1x1xf32>
    %c0_9 = arith.constant 0 : index
    %c0_10 = arith.constant 0 : index
    %19 = vector.load %arg3[%c0_9, %c0_10] : memref<1x1xf32, #tpu.memory_space<vmem>>, vector<1x1xf32>
    tpu.vector_store %arg3[%c0_9, %c0_10], %18 {strides = array<i32>} : memref<1x1xf32, #tpu.memory_space<vmem>>, vector<1x1xf32>,
    return
  }
  func.func @transform_0(%arg0: i32) -> (i32, i32) {
    %c0_i32 = arith.constant 0 : i32
    %c0_i32_0 = arith.constant 0 : i32
    return %arg0, %c0_i32 : i32, i32
  }
  func.func @transform_1(%arg0: i32) -> (i32, i32) {
    %c0_i32 = arith.constant 0 : i32
    %c0_i32_0 = arith.constant 0 : i32
    %c0_i32_1 = arith.constant 0 : i32
    return %c0_i32, %c0_i32_0 : i32, i32
  }
  func.func @transform_2(%arg0: i32) -> (i32, i32) {
    %c0_i32 = arith.constant 0 : i32
    %c0_i32_0 = arith.constant 0 : i32
    %c0_i32_1 = arith.constant 0 : i32
    return %c0_i32, %c0_i32_0 : i32, i32
  }
}

module attributes {stable_mosaic.version = 11 : i64} {
  func.func @_normalize_kernel(%arg0: i32, %arg1: memref<2xf32, #tpu.memory_space<smem>>, %arg2: memref<3x512xf32, #tpu.memory_space<vmem>>, %arg3: memref<3x512xf32, #tpu.memory_space<vmem>>) attributes {dimension_semantics = [#tpu.dimension_semantics<parallel>], iteration_bounds = array<i64: 1>, scalar_prefetch = 0 : i64, scratch_operands = 0 : i64, tpu.core_type = #tpu.core_type<tc>, window_params = [{transform_indices = @transform_0, window_bounds = array<i64: 2>}, {transform_indices = @transform_1, window_bounds = array<i64: 3, 512>}, {transform_indices = @transform_2, window_bounds = array<i64: 3, 512>}]} {
    %c0 = arith.constant 0 : index
    %0 = memref.load %arg1[%c0] : memref<2xf32, #tpu.memory_space<smem>>
    %c1 = arith.constant 1 : index
    %1 = memref.load %arg1[%c1] : memref<2xf32, #tpu.memory_space<smem>>
    %c0_0 = arith.constant 0 : index
    %c0_1 = arith.constant 0 : index
    %2 = vector.load %arg2[%c0_0, %c0_1] : memref<3x512xf32, #tpu.memory_space<vmem>>, vector<3x512xf32>
    %3 = vector.broadcast %0 : f32 to vector<3x512xf32>
    %4 = arith.subf %2, %3 : vector<3x512xf32>
    %5 = vector.broadcast %1 : f32 to vector<3x512xf32>
    %6 = arith.mulf %4, %5 : vector<3x512xf32>
    %c0_2 = arith.constant 0 : index
    %c0_3 = arith.constant 0 : index
    %7 = vector.load %arg3[%c0_2, %c0_3] : memref<3x512xf32, #tpu.memory_space<vmem>>, vector<3x512xf32>
    tpu.vector_store %arg3[%c0_2, %c0_3], %6 {strides = array<i32>} : memref<3x512xf32, #tpu.memory_space<vmem>>, vector<3x512xf32>,
    return
  }
  func.func @transform_0(%arg0: i32) -> i32 {
    %c0_i32 = arith.constant 0 : i32
    %c0_i32_0 = arith.constant 0 : i32
    return %c0_i32 : i32
  }
  func.func @transform_1(%arg0: i32) -> (i32, i32) {
    %c0_i32 = arith.constant 0 : i32
    %c0_i32_0 = arith.constant 0 : i32
    return %arg0, %c0_i32 : i32, i32
  }
  func.func @transform_2(%arg0: i32) -> (i32, i32) {
    %c0_i32 = arith.constant 0 : i32
    %c0_i32_0 = arith.constant 0 : i32
    return %arg0, %c0_i32 : i32, i32
  }
}

module attributes {stable_mosaic.version = 11 : i64} {
  func.func @_depth_combine_kernel(%arg0: i32, %arg1: memref<1x256xf32, #tpu.memory_space<vmem>>, %arg2: memref<1x256xf32, #tpu.memory_space<vmem>>, %arg3: memref<1x256xf32, #tpu.memory_space<vmem>>) attributes {dimension_semantics = [#tpu.dimension_semantics<parallel>], iteration_bounds = array<i64: 1>, scalar_prefetch = 0 : i64, scratch_operands = 0 : i64, tpu.core_type = #tpu.core_type<tc>, window_params = [{transform_indices = @transform_0, window_bounds = array<i64: 1, 256>}, {transform_indices = @transform_1, window_bounds = array<i64: 1, 256>}, {transform_indices = @transform_2, window_bounds = array<i64: 1, 256>}]} {
    %c0 = arith.constant 0 : index
    %c0_0 = arith.constant 0 : index
    %0 = vector.load %arg2[%c0, %c0_0] : memref<1x256xf32, #tpu.memory_space<vmem>>, vector<1x256xf32>
    %cst = arith.constant 2.560000e+02 : f32
    %1 = vector.broadcast %cst : f32 to vector<1x256xf32>
    %2 = arith.mulf %1, %0 : vector<1x256xf32>
    %c0_1 = arith.constant 0 : index
    %c0_2 = arith.constant 0 : index
    %3 = vector.load %arg1[%c0_1, %c0_2] : memref<1x256xf32, #tpu.memory_space<vmem>>, vector<1x256xf32>
    %4 = arith.addf %2, %3 : vector<1x256xf32>
    %c0_3 = arith.constant 0 : index
    %c0_4 = arith.constant 0 : index
    %5 = vector.load %arg3[%c0_3, %c0_4] : memref<1x256xf32, #tpu.memory_space<vmem>>, vector<1x256xf32>
    tpu.vector_store %arg3[%c0_3, %c0_4], %4 {strides = array<i32>} : memref<1x256xf32, #tpu.memory_space<vmem>>, vector<1x256xf32>,
    return
  }
  func.func @transform_0(%arg0: i32) -> (i32, i32) {
    %c0_i32 = arith.constant 0 : i32
    %c0_i32_0 = arith.constant 0 : i32
    return %arg0, %c0_i32 : i32, i32
  }
  func.func @transform_1(%arg0: i32) -> (i32, i32) {
    %c0_i32 = arith.constant 0 : i32
    %c0_i32_0 = arith.constant 0 : i32
    return %arg0, %c0_i32 : i32, i32
  }
  func.func @transform_2(%arg0: i32) -> (i32, i32) {
    %c0_i32 = arith.constant 0 : i32
    %c0_i32_0 = arith.constant 0 : i32
    return %arg0, %c0_i32 : i32, i32
  }
}

</mosaic_0001>

<bundles_post_ra>
// kernel: pre_forward.3
= control target key start
LH: loop header
LB: loop body
LE: loop exit
PB: predicated region body
PF: predicated region fallthrough
CT: control target
= control target key end

     0   :  { %8 = vsyncpa [#allocation3], 0  ;;  %s222_s0 = inlined_call_operand.vmem [shape: f32[3,512], index: 0, kind: input, shape index: {}]   ;;  %s223_s1 = inlined_call_operand.hbm [shape: f32[1,1], index: 1, kind: output, shape index: {0}]   ;;  %s224_s2 = inlined_call_operand.hbm [shape: f32[1,1], index: 2, kind: output, shape index: {1}]  }
   0x1   :  { %v19_v0 = vld [vmem:[%s222_s0] sm:$0x77]  ;;  %v20_v1 = vld [vmem:[%s222_s0 + $0x8] sm:$0x77] }
   0x2   :  { %24 = vst [vmem:[#allocation1] ss:$2 sm:$0xff] %v19_v0 }
   0x3   :  { %9 = vsyncpa [#allocation5], 0  ;;  %26 = vst [vmem:[#allocation1 + $0x10] ss:$2 sm:$0xff] %v20_v1  ;;  %vm35_vm0 = vcmask 1042432   ;;  %vm16_vm1 = vcmask 0  }
   0x4   :  { %v179_v24 = vmov inf   ;;  %v180_v39 = vmov -inf   ;;  %s181_s0 = smov [#allocation2]   ;;  %s94_s16 = sshll.u32 %s223_s1, 4  ;;  %s95_s16 = int_to_ptr.hbm [resolvable:$true] %s94_s16 }
   0x5   :  { %17 = vst.msk [vmem:[#allocation2] sm:$0x1] %vm16_vm1, %v179_v24  ;;  %s92_s13 = sshll.u32 %s181_s0, 4  ;;  %s182_s18 = smov [#allocation4]   ;;  %s93_s13 = int_to_ptr.vmem [resolvable:$true] %s92_s13 }
   0x6   :  { %18 = vst.msk [vmem:[#allocation4] sm:$0x1] %vm16_vm1, %v180_v39  ;;  %s103_s19 = sshll.u32 %s182_s18, 4  ;;  %s105_s22 = sshll.u32 %s224_s2, 4  ;;  %s104_s19 = int_to_ptr.vmem [resolvable:$true] %s103_s19  ;;  %s106_s22 = int_to_ptr.hbm [resolvable:$true] %s105_s22 }
   0x9   :  { %v27_v2 = vld.sshfl [vmem:[#allocation1] sm:$0xff pattern:$0x75316420]  ;;  %v28_v3 = vld.sshfl [vmem:[#allocation1 + $0x8] sm:$0xff pattern:$0x75316420] }
   0xa   :  { %v29_v4 = vld.sshfl [vmem:[#allocation1 + $0x10] sm:$0xff pattern:$0x75316420]  ;;  %v30_v5 = vld.sshfl [vmem:[#allocation1 + $0x18] sm:$0xff pattern:$0x75316420] }
   0xb   :  { %v36_v6 = vsel %vm35_vm0, %v27_v2, inf  ;;  %v37_v7 = vsel %vm35_vm0, %v28_v3, inf  ;;  %v38_v8 = vsel %vm35_vm0, %v29_v4, inf  ;;  %v39_v9 = vsel %vm35_vm0, %v30_v5, inf  ;;  %57 = vst [vmem:[#allocation1] ss:$2 sm:$0xff] %v19_v0 }
   0xc   :  { %v40_v10 = vmin.f32 %v36_v6, %v37_v7  ;;  %v41_v11 = vmin.f32 %v38_v8, %v39_v9  ;;  %59 = vst [vmem:[#allocation1 + $0x10] ss:$2 sm:$0xff] %v20_v1  ;;  %v21_v40 = vld [vmem:[#allocation2] sm:$0x1] }
   0xd   :  { %v56_v43 = vld [vmem:[#allocation4] sm:$0x1] }
   0xe   :  { %v42_v12 = vmin.f32 %v40_v10, %v41_v11 }
  0x10   :  { %43 = vmin.xlane.f32.xlu0 %v42_v12 }
  0x12   :  { %v60_v13 = vld.sshfl [vmem:[#allocation1] sm:$0xff pattern:$0x75316420]  ;;  %v61_v14 = vld.sshfl [vmem:[#allocation1 + $0x8] sm:$0xff pattern:$0x75316420] }
  0x13   :  { %v62_v15 = vld.sshfl [vmem:[#allocation1 + $0x10] sm:$0xff pattern:$0x75316420]  ;;  %v63_v16 = vld.sshfl [vmem:[#allocation1 + $0x18] sm:$0xff pattern:$0x75316420] }
  0x14   :  { %v68_v17 = vsel %vm35_vm0, %v60_v13, -inf  ;;  %v69_v18 = vsel %vm35_vm0, %v61_v14, -inf  ;;  %v70_v19 = vsel %vm35_vm0, %v62_v15, -inf  ;;  %v71_v20 = vsel %vm35_vm0, %v63_v16, -inf }
  0x15   :  { %v72_v21 = vmax.f32 %v68_v17, %v69_v18  ;;  %v73_v22 = vmax.f32 %v70_v19, %v71_v20 }
  0x17   :  { %v74_v23 = vmax.f32 %v72_v21, %v73_v22 }
  0x19   :  { %75 = vmax.xlane.f32.xlu0 %v74_v23 }
  0x83   :  { %v44_v25 = vpop.xlane.xlu0 %43 }
  0x84   :  { %v45_v26 = vrot.slane %v44_v25, 4 }
  0x86   :  { %v46_v27 = vmin.f32 %v44_v25, %v45_v26 }
  0x88   :  { %v47_v28 = vrot.slane %v46_v27, 2 }
  0x8a   :  { %v48_v29 = vmin.f32 %v46_v27, %v47_v28 }
  0x8c   :  { %v76_v30 = vpop.xlane.xlu0 %75  ;;  %v49_v31 = vrot.slane %v48_v29, 1 }
  0x8d   :  { %v77_v32 = vrot.slane %v76_v30, 4 }
  0x8e   :  { %v50_v33 = vmin.f32 %v48_v29, %v49_v31 }
  0x8f   :  { %v78_v34 = vmax.f32 %v76_v30, %v77_v32 }
  0x90   :  { %119 = vpush %v50_v33 }
  0x91   :  { %v79_v35 = vrot.slane %v78_v34, 2 }
  0x93   :  { %v80_v36 = vmax.f32 %v78_v34, %v79_v35 }
  0x95   :  { %v81_v37 = vrot.slane %v80_v36, 1 }
  0x97   :  { %v82_v38 = vmax.f32 %v80_v36, %v81_v37 }
  0x99   :  { %121 = vpush %v82_v38 }
  0xc1   :  { %s120_s17 = spop %119 }
  0xc2   :  { %v52_v41 = vstv %s120_s17 }
  0xc3   :  { %v53_v42 = vmin.f32 %v21_v40, %v52_v41 }
  0xc5   :  { %55 = vst.msk [vmem:[#allocation2] sm:$0x1] %vm16_vm1, %v53_v42 }
  0xc6   :  { %97 = dma.vmem_to_hbm [thread:$0]  %s93_s13, 16, %s95_s16, [#allocation3]  }
  0xca   :  { %s122_s23 = spop %121 }
  0xcb   :  { %v84_v44 = vstv %s122_s23 }
  0xcc   :  { %v85_v45 = vmax.f32 %v56_v43, %v84_v44 }
  0xce   :  { %86 = vst.msk [vmem:[#allocation4] sm:$0x1] %vm16_vm1, %v85_v45 }
  0xcf   :  { %108 = dma.vmem_to_hbm [thread:$0]  %s104_s19, 16, %s106_s22, [#allocation5]  }
  0xd0   :  { %175 = dma.done.wait [#allocation3], 16  }
  0xd1   :  { %176 = vsyncadd [#allocation3], 4294967280 }
  0xd2   :  { %177 = dma.done.wait [#allocation5], 16  }
  0xd3   :  { %178 = vsyncadd [#allocation5], 4294967280 }
  0xd4   :  { %117 = vsyncpa [#allocation3], 1 }
  0xd5   :  { %118 = vsyncpa [#allocation5], 1 }

// kernel: pre_forward.4
= control target key start
LH: loop header
LB: loop body
LE: loop exit
PB: predicated region body
PF: predicated region fallthrough
CT: control target
= control target key end

     0   :  { %7 = vsyncpa [#allocation3], 0  ;;  %s57_s12 = smov [#allocation2]   ;;  %s88_s0 = inlined_call_operand.vmem [shape: f32[2], index: 0, kind: input, shape index: {}]   ;;  %s89_s1 = inlined_call_operand.vmem [shape: f32[3,512], index: 1, kind: input, shape index: {}]   ;;  %s90_s2 = inlined_call_operand.vmem [shape: f32[3,512], index: 2, kind: output, shape index: {}]  }
   0x1   :  { %s13_s11 = sshll.u32 %s88_s0, 4  ;;  %s14_s11 = int_to_ptr.vmem [resolvable:$true] %s13_s11 }
   0x2   :  { %16 = dma.vmem_to_smem %s14_s11, 16, %s57_s12, [#allocation3]  }
   0x3   :  { %55 = dma.done.wait [#allocation3], 16  }
   0x4   :  { %56 = vsyncadd [#allocation3], 4294967280 }
   0x5   :  { %23 = sfence }
   0x6   :  { %s24_s13 = sld [smem:[#allocation2]]  ;;  %v26_v0 = vld [vmem:[%s89_s1] sm:$0x77]  ;;  %v27_v1 = vld [vmem:[%s89_s1 + $0x8] sm:$0x77] }
   0x7   :  { %s41_s14 = sld [smem:[#allocation2 + $0x1]] }
   0xc   :  { %v28_v2 = vstv %s24_s13 }
   0xd   :  { %v29_v3 = vsub.f32 %v26_v0, %v28_v2  ;;  %v31_v4 = vstv %s41_s14  ;;  %v30_v5 = vsub.f32 %v27_v1, %v28_v2 }
   0xf   :  { %v32_v6 = vmul.f32 %v31_v4, %v29_v3  ;;  %v33_v7 = vmul.f32 %v31_v4, %v30_v5 }
  0x11   :  { %34 = vst [vmem:[%s90_s2] sm:$0x77] %v32_v6 }
  0x12   :  { %35 = vst [vmem:[%s90_s2 + $0x8] sm:$0x77] %v33_v7 }
  0x13   :  { %40 = vsyncpa [#allocation3], 1 }

// kernel: pre_forward.5
= control target key start
LH: loop header
LB: loop body
LE: loop exit
PB: predicated region body
PF: predicated region fallthrough
CT: control target
= control target key end

     0   :  { %v15_v0 = vlaneseq  ;;  %s48_s0 = inlined_call_operand.vmem [shape: f32[1,256], index: 0, kind: input, shape index: {}]   ;;  %s49_s1 = inlined_call_operand.vmem [shape: f32[1,256], index: 1, kind: input, shape index: {}]   ;;  %s50_s2 = inlined_call_operand.vmem [shape: f32[1,256], index: 2, kind: output, shape index: {}]  }
   0x1   :  { %v11_v1 = vld [vmem:[%s49_s1] sm:$0x3] }
   0x2   :  { %v13_v2 = vld [vmem:[%s48_s0] sm:$0x3]  ;;  %v12_v3 = vmul.f32 256.0, %v11_v1  ;;  %vm17_vm0 = vcmp.lt.s32.totalorder %v15_v0, 256 }
   0x4   :  { %v14_v4 = vadd.f32 %v13_v2, %v12_v3 }
   0x6   :  { %19 = vst.msk [vmem:[%s50_s2] sm:$0x3] %vm17_vm0, %v14_v4 }

</bundles_post_ra>
